<compile_context>
chip_gen: v6e
topology: v6e:2x2x1
jax: 0.10.0
libtpu: 0.0.40
codegen_flags: <defaults>
</compile_context>

<pallas_src>
import functools

import jax
import jax.numpy as jnp
from jax.experimental import pallas as pl
from jax.experimental.pallas import tpu as pltpu


def _round_up(x, m):
    return (x + m - 1) // m * m


def _cdiv(a, b):
    return (a + b - 1) // b


def _hw_info():
    """Device generation string + VMEM capacity (bytes), with safe fallbacks."""
    try:
        kind = jax.devices()[0].device_kind.lower()
    except Exception:
        kind = ""
    cap = 64 << 20 if "v7" in kind else 128 << 20
    try:
        cap = int(pltpu.get_tpu_info().vmem_capacity_bytes)
    except Exception:
        pass
    return kind, cap


_DEVICE_KIND, _VMEM_CAPACITY = _hw_info()
_HAS_BF16_VALU = ("v6" in _DEVICE_KIND) or ("v7" in _DEVICE_KIND)


def _ffn_kernel(x_ref, w1_ref, b1_ref, w2_ref, b2_ref, o_ref, *scratch,
                acc_mode, relu_low_precision):
    """One (m-tile, d_ffn-slice) step of y = relu(x@W1 + b1) @ W2 + b2."""
    # First matmul (MXU, f32 accumulation).
    h = jnp.dot(x_ref[...], w1_ref[...], preferred_element_type=jnp.float32)
    if relu_low_precision:
        # bf16 bias + ReLU (v6e/v7x have bf16 VALU): halves the (tm, tk)
        # intermediate and removes a separate f32->bf16 cast pass.
        h = h.astype(b1_ref.dtype)
    h = jnp.maximum(h + b1_ref[...], 0.0)
    # TODO(synk): dropout is identity here (eval mode); training-mode dropout
    # would use pltpu.prng_seed / pltpu.prng_random_bits.
    h = h.astype(w2_ref.dtype)

    # Second matmul on this d_ffn slice (f32 accumulation).
    y = jnp.dot(h, w2_ref[...], preferred_element_type=jnp.float32)

    if acc_mode == "none":
        # Weights-resident (single k step): write the tile directly.
        o_ref[...] = (y + b2_ref[...]).astype(o_ref.dtype)
    elif acc_mode == "out":
        # f32 output: accumulate straight into the resident output block.
        k = pl.program_id(1)

        @pl.when(k == 0)
        def _():
            o_ref[...] = jnp.broadcast_to(b2_ref[...], o_ref.shape)

        o_ref[...] += y
    else:  # "scratch" (non-f32 output, K-tiled)
        acc_ref = scratch[0]
        k = pl.program_id(1)

        @pl.when(k == 0)
        def _():
            acc_ref[...] = jnp.zeros_like(acc_ref)

        acc_ref[...] += y

        @pl.when(k == pl.num_programs(1) - 1)
        def _():
            o_ref[...] = (acc_ref[...] + b2_ref[...]).astype(o_ref.dtype)


def _m_tiling(M, tm_target):
    """Pick (tm_eff, num_m): minimal tail padding, >=2 and even tiles for
    v7x megacore balance when M allows it."""
    num_m = max(_cdiv(M, max(tm_target, 8)), 1)
    if M > 8 and num_m == 1:
        num_m = 2
    if num_m > 1 and num_m % 2 == 1:
        num_m += 1
    tm_eff = _round_up(_cdiv(M, num_m), 8)
    return tm_eff, num_m


@functools.partial(jax.jit, static_argnames=("tm", "tk", "compute_dtype"))
def pointwise_ffn(x, w1, b1, w2, b2, *, tm=256, tk=512, compute_dtype="auto"):
    """x: [B, S, d_model]; w1: [d_model, d_ffn]; b1: [d_ffn];
    w2: [d_ffn, d_model]; b2: [d_model]."""
    B, S, d_model = x.shape
    d_ffn = w1.shape[1]
    out_dtype = x.dtype
    out_isz = jnp.dtype(out_dtype).itemsize

    # ---- compute dtype (default: bf16 MXU path with f32 accumulation) ------
    if compute_dtype == "auto":
        cdt = jnp.bfloat16 if jnp.dtype(x.dtype) == jnp.float32 \
            else jnp.dtype(x.dtype)
    elif compute_dtype is None:
        cdt = jnp.dtype(x.dtype)
    else:
        cdt = jnp.dtype(compute_dtype)
    in_isz = jnp.dtype(cdt).itemsize
    relu_low_precision = (jnp.dtype(cdt) == jnp.bfloat16) and _HAS_BF16_VALU

    # TODO(synk): for repeated calls, cast/pad the weights once outside this
    # wrapper to avoid a per-call HBM round trip for the casts below.
    x = x.astype(cdt)
    w1 = w1.astype(cdt)
    w2 = w2.astype(cdt)
    b1 = b1.astype(cdt if relu_low_precision else jnp.float32)
    b2 = b2.astype(jnp.float32)

    M = B * S
    d_model_p = _round_up(d_model, 128)
    d_ffn_full_p = _round_up(d_ffn, 128)
    cap = _VMEM_CAPACITY
    h_isz = 2 if relu_low_precision else 4

    def estimate(tm_eff, tk_eff, wbuf, use_scratch):
        est = 2 * tm_eff * d_model_p * in_isz          # x (double-buffered)
        est += 2 * tm_eff * d_model_p * out_isz        # out (double-buffered)
        est += wbuf * d_model_p * tk_eff * in_isz      # W1 tile(s)
        est += wbuf * tk_eff * d_model_p * in_isz      # W2 tile(s)
        est += wbuf * 8 * tk_eff * 4                   # b1 (sublane-padded)
        est += 8 * d_model_p * 4                       # b2
        est += tm_eff * tk_eff * h_isz                 # (tm, tk) intermediate
        est += tm_eff * d_model_p * 4                  # f32 2nd-matmul result
        if use_scratch:
            est += tm_eff * d_model_p * 4              # f32 accumulator
        return est

    # ---- prefer weights-resident (num_k == 1) when it fits in VMEM ---------
    tm_eff, num_m = _m_tiling(M, tm)
    est_resident = estimate(tm_eff, d_ffn_full_p, 1, False)
    resident = est_resident <= 0.70 * cap

    if resident:
        tk_eff, num_k, wbuf = d_ffn_full_p, 1, 1
        acc_mode = "none"
        vmem_est = est_resident
    else:
        tk_eff = _round_up(min(tk, d_ffn_full_p), 128)
        num_k = _cdiv(d_ffn, tk_eff)
        # Streaming weights: raise tm so arithmetic intensity (~2*tm/itemsize
        # flop/byte) clears the generation's HBM knee.
        if in_isz <= 2:
            tm_target = max(tm, 384 if ("v7" in _DEVICE_KIND or
                                        "v5" in _DEVICE_KIND) else 640)
        else:
            tm_target = max(tm, 768)
        acc_mode = "out" if jnp.dtype(out_dtype) == jnp.float32 else "scratch"
        use_scratch = acc_mode == "scratch"
        while True:
            tm_eff, num_m = _m_tiling(M, tm_target)
            vmem_est = estimate(tm_eff, tk_eff, 2, use_scratch)
            if vmem_est <= 0.80 * cap or tm_target <= 64:
                break
            tm_target //= 2
        # Deeper weight pipeline only when comfortably inside VMEM.
        wbuf = 3 if estimate(tm_eff, tk_eff, 3, use_scratch) <= 0.60 * cap else 2
        vmem_est = estimate(tm_eff, tk_eff, wbuf, use_scratch)

    d_ffn_p = num_k * tk_eff
    M_p = num_m * tm_eff

    # ---- zero-pad (skipped when already aligned) ----------------------------
    def pad2(a, rows, cols):
        pr, pc = rows - a.shape[0], cols - a.shape[1]
        return jnp.pad(a, ((0, pr), (0, pc))) if (pr or pc) else a

    def pad1(a, n):
        p = n - a.shape[0]
        return jnp.pad(a, (0, p)) if p else a

    x2 = pad2(x.reshape(M, d_model), M_p, d_model_p)
    w1p = pad2(w1, d_model_p, d_ffn_p)
    b1p = pad1(b1, d_ffn_p).reshape(1, d_ffn_p)
    w2p = pad2(w2, d_ffn_p, d_model_p)
    b2p = pad1(b2, d_model_p).reshape(1, d_model_p)

    def wspec(shape, imap):
        return pl.BlockSpec(shape, imap, pipeline_mode=pl.Buffered(wbuf))

    in_specs = [
        pl.BlockSpec((tm_eff, d_model_p), lambda i, k: (i, 0)),   # x rows
        wspec((d_model_p, tk_eff), lambda i, k: (0, k)),          # W1 slice
        wspec((1, tk_eff), lambda i, k: (0, k)),                  # b1 slice
        wspec((tk_eff, d_model_p), lambda i, k: (k, 0)),          # W2 slice
        pl.BlockSpec((1, d_model_p), lambda i, k: (0, 0),
                     pipeline_mode=pl.Buffered(1)),               # b2 (const)
    ]
    out_spec = pl.BlockSpec((tm_eff, d_model_p), lambda i, k: (i, 0))
    scratch_shapes = ([pltpu.VMEM((tm_eff, d_model_p), jnp.float32)]
                      if acc_mode == "scratch" else [])

    # Generation-aware scoped-VMEM budget (estimate + headroom, <= ~capacity).
    vmem_limit = int(min(max(vmem_est * 1.3 + (4 << 20), 32 << 20),
                         cap * 0.92))

    # Honest streamed-bytes estimate: weights re-streamed per m-tile if K-tiled.
    w_bytes = 2 * d_model_p * d_ffn_p * in_isz
    w_streams = num_m if num_k > 1 else 1
    cost = pl.CostEstimate(
        flops=4 * M_p * d_model_p * d_ffn_p,
        transcendentals=0,
        bytes_accessed=int(M_p * d_model_p * in_isz
                           + w_streams * w_bytes
                           + d_ffn_p * 4 + d_model_p * 4
                           + M_p * d_model_p * out_isz),
    )

    kernel = functools.partial(_ffn_kernel, acc_mode=acc_mode,
                               relu_low_precision=relu_low_precision)

    out = pl.pallas_call(
        kernel,
        out_shape=jax.ShapeDtypeStruct((M_p, d_model_p), out_dtype),
        grid_spec=pltpu.PrefetchScalarGridSpec(
            num_scalar_prefetch=0,
            grid=(num_m, num_k),
            in_specs=in_specs,
            out_specs=out_spec,
            scratch_shapes=scratch_shapes,
        ),
        compiler_params=pltpu.CompilerParams(
            dimension_semantics=("parallel", "arbitrary"),
            vmem_limit_bytes=vmem_limit,
        ),
        cost_estimate=cost,
    )(x2, w1p, b1p, w2p, b2p)

    if M_p != M or d_model_p != d_model:
        out = out[:M, :d_model]
    return out.reshape(B, S, d_model)


def init_params(key, d_model, d_ffn, dtype=jnp.float32):
    """Deterministic init mimicking nn.Linear's uniform(-1/sqrt(fan_in), ...)."""
    k1, k2, k3, k4 = jax.random.split(key, 4)
    lim1 = 1.0 / (d_model ** 0.5)
    lim2 = 1.0 / (d_ffn ** 0.5)
    w1 = jax.random.uniform(k1, (d_model, d_ffn), dtype, -lim1, lim1)
    b1 = jax.random.uniform(k2, (d_ffn,), dtype, -lim1, lim1)
    w2 = jax.random.uniform(k3, (d_ffn, d_model), dtype, -lim2, lim2)
    b2 = jax.random.uniform(k4, (d_model,), dtype, -lim2, lim2)
    return w1, b1, w2, b2


if __name__ == "__main__":
    key = jax.random.PRNGKey(0)
    kx, kp = jax.random.split(key)

    B, S, d_model, d_ffn = 2, 8, 32, 64
    x = jax.random.normal(kx, (B, S, d_model), dtype=jnp.float32)
    w1, b1, w2, b2 = init_params(kp, d_model, d_ffn)

    # Pure-JAX reference (dropout is identity in eval mode).
    ref = jnp.maximum(x @ w1 + b1, 0.0) @ w2 + b2

    # Exact f32 path.
    y32 = jax.block_until_ready(
        pointwise_ffn(x, w1, b1, w2, b2, compute_dtype=jnp.float32))
    assert y32.shape == (B, S, d_model)
    assert jnp.allclose(y32, ref, atol=1e-5, rtol=1e-5), "f32 mismatch vs ref"

    # Default path (bf16 MXU compute with f32 accumulation); looser tolerance.
    y = jax.block_until_ready(pointwise_ffn(x, w1, b1, w2, b2))
    assert y.shape == (B, S, d_model)
    assert jnp.allclose(y, ref, atol=5e-2, rtol=5e-2), "default path mismatch"

    # Unaligned shapes exercise the padding / tail-tile path.
    B2, S2, dm2, df2 = 2, 13, 48, 100
    x2 = jax.random.normal(kx, (B2, S2, dm2), dtype=jnp.float32)
    p2 = init_params(kp, dm2, df2)
    ref2 = jnp.maximum(x2 @ p2[0] + p2[1], 0.0) @ p2[2] + p2[3]
    y2 = jax.block_until_ready(
        pointwise_ffn(x2, *p2, compute_dtype=jnp.float32))
    assert jnp.allclose(y2, ref2, atol=1e-5, rtol=1e-5), "padded f32 mismatch"

    print("KERNEL_OK")
</pallas_src>

<mosaic_0001>
module attributes {stable_mosaic.version = 11 : i64} {
  func.func @_ffn_kernel(%arg0: i32, %arg1: i32, %arg2: memref<8x128xf32, #tpu.memory_space<vmem>>, %arg3: memref<128x128xf32, #tpu.memory_space<vmem>>, %arg4: memref<1x128xf32, #tpu.memory_space<vmem>>, %arg5: memref<128x128xf32, #tpu.memory_space<vmem>>, %arg6: memref<1x128xf32, #tpu.memory_space<vmem>>, %arg7: memref<8x128xf32, #tpu.memory_space<vmem>>) attributes {dimension_semantics = [#tpu.dimension_semantics<parallel>, #tpu.dimension_semantics<arbitrary>], iteration_bounds = array<i64: 2, 1>, scalar_prefetch = 0 : i64, scratch_operands = 0 : i64, tpu.core_type = #tpu.core_type<tc>, window_params = [{transform_indices = @transform_0, window_bounds = array<i64: 8, 128>}, {pipeline_mode = #tpu.pipeline_mode<synchronous>, transform_indices = @transform_1, window_bounds = array<i64: 128, 128>}, {pipeline_mode = #tpu.pipeline_mode<synchronous>, transform_indices = @transform_2, window_bounds = array<i64: 1, 128>}, {pipeline_mode = #tpu.pipeline_mode<synchronous>, transform_indices = @transform_3, window_bounds = array<i64: 128, 128>}, {pipeline_mode = #tpu.pipeline_mode<synchronous>, transform_indices = @transform_4, window_bounds = array<i64: 1, 128>}, {transform_indices = @transform_5, window_bounds = array<i64: 8, 128>}]} {
    %c0 = arith.constant 0 : index
    %c0_0 = arith.constant 0 : index
    %0 = vector.load %arg2[%c0, %c0_0] : memref<8x128xf32, #tpu.memory_space<vmem>>, vector<8x128xf32>
    %c0_1 = arith.constant 0 : index
    %c0_2 = arith.constant 0 : index
    %1 = vector.load %arg3[%c0_1, %c0_2] : memref<128x128xf32, #tpu.memory_space<vmem>>, vector<128x128xf32>
    %cst = arith.constant dense<0.000000e+00> : vector<8x128xf32>
    %2 = tpu.matmul %0, %1, %cst {dimension_numbers = #tpu.dot_dimension_numbers<[1], [0], [0], [1], [0, 0, 1, 1], [], []>} : vector<8x128xf32>, vector<128x128xf32>, vector<8x128xf32> -> vector<8x128xf32>
    %c0_3 = arith.constant 0 : index
    %c0_4 = arith.constant 0 : index
    %3 = vector.load %arg4[%c0_3, %c0_4] : memref<1x128xf32, #tpu.memory_space<vmem>>, vector<1x128xf32>
    %4 = vector.broadcast %3 : vector<1x128xf32> to vector<8x128xf32>
    %5 = arith.addf %2, %4 : vector<8x128xf32>
    %cst_5 = arith.constant 0.000000e+00 : f32
    %6 = vector.broadcast %cst_5 : f32 to vector<8x128xf32>
    %7 = arith.maximumf %5, %6 : vector<8x128xf32>
    %c0_6 = arith.constant 0 : index
    %c0_7 = arith.constant 0 : index
    %8 = vector.load %arg5[%c0_6, %c0_7] : memref<128x128xf32, #tpu.memory_space<vmem>>, vector<128x128xf32>
    %cst_8 = arith.constant dense<0.000000e+00> : vector<8x128xf32>
    %9 = tpu.matmul %7, %8, %cst_8 {dimension_numbers = #tpu.dot_dimension_numbers<[1], [0], [0], [1], [0, 0, 1, 1], [], []>} : vector<8x128xf32>, vector<128x128xf32>, vector<8x128xf32> -> vector<8x128xf32>
    %c0_9 = arith.constant 0 : index
    %c0_10 = arith.constant 0 : index
    %10 = vector.load %arg6[%c0_9, %c0_10] : memref<1x128xf32, #tpu.memory_space<vmem>>, vector<1x128xf32>
    %11 = vector.broadcast %10 : vector<1x128xf32> to vector<8x128xf32>
    %12 = arith.addf %9, %11 : vector<8x128xf32>
    %c0_11 = arith.constant 0 : index
    %c0_12 = arith.constant 0 : index
    %13 = vector.load %arg7[%c0_11, %c0_12] : memref<8x128xf32, #tpu.memory_space<vmem>>, vector<8x128xf32>
    tpu.vector_store %arg7[%c0_11, %c0_12], %12 {strides = array<i32>} : memref<8x128xf32, #tpu.memory_space<vmem>>, vector<8x128xf32>,
    return
  }
  func.func @transform_0(%arg0: i32, %arg1: i32) -> (i32, i32) {
    %c0_i32 = arith.constant 0 : i32
    %c0_i32_0 = arith.constant 0 : i32
    return %arg0, %c0_i32 : i32, i32
  }
  func.func @transform_1(%arg0: i32, %arg1: i32) -> (i32, i32) {
    %c0_i32 = arith.constant 0 : i32
    %c0_i32_0 = arith.constant 0 : i32
    return %c0_i32, %arg1 : i32, i32
  }
  func.func @transform_2(%arg0: i32, %arg1: i32) -> (i32, i32) {
    %c0_i32 = arith.constant 0 : i32
    %c0_i32_0 = arith.constant 0 : i32
    return %c0_i32, %arg1 : i32, i32
  }
  func.func @transform_3(%arg0: i32, %arg1: i32) -> (i32, i32) {
    %c0_i32 = arith.constant 0 : i32
    %c0_i32_0 = arith.constant 0 : i32
    return %arg1, %c0_i32 : i32, i32
  }
  func.func @transform_4(%arg0: i32, %arg1: i32) -> (i32, i32) {
    %c0_i32 = arith.constant 0 : i32
    %c0_i32_0 = arith.constant 0 : i32
    %c0_i32_1 = arith.constant 0 : i32
    return %c0_i32, %c0_i32_0 : i32, i32
  }
  func.func @transform_5(%arg0: i32, %arg1: i32) -> (i32, i32) {
    %c0_i32 = arith.constant 0 : i32
    %c0_i32_0 = arith.constant 0 : i32
    return %arg0, %c0_i32 : i32, i32
  }
}

</mosaic_0001>

<bundles_post_ra>
// kernel: pointwise_ffn.1
= control target key start
LH: loop header
LB: loop body
LE: loop exit
PB: predicated region body
PF: predicated region fallthrough
CT: control target
= control target key end

     0   :  { %s778_s18 = smov 0   ;;  %s780_s19 = smov 0   ;;  %s958_s0 = inlined_call_operand.vmem [shape: f32[16,128], index: 0, kind: input, shape index: {}]   ;;  %s959_s1 = inlined_call_operand.vmem [shape: f32[128,128], index: 1, kind: input, shape index: {}]   ;;  %s960_s2 = inlined_call_operand.vmem [shape: f32[1,128], index: 2, kind: input, shape index: {}]   ;;  %s961_s3 = inlined_call_operand.vmem [shape: f32[128,128], index: 3, kind: input, shape index: {}]   ;;  %s962_s4 = inlined_call_operand.vmem [shape: f32[1,128], index: 4, kind: input, shape index: {}]   ;;  %s963_s5 = inlined_call_operand.vmem [shape: f32[16,128], index: 5, kind: output, shape index: {}]  }
   0x1   :  { %s782_s20 = smov 0  }
   0x2 LB: > { %s27_s21 = sadd.s32 1, %s740_s19  ;;  %p585_p0 = scmp.ge.s32.totalorder %s744_s20, 1  ;;  %s744_s20 = sphi %s782_s20, %s15_s20   ;;  %s740_s19 = sphi %s780_s19, %s965_s19   ;;  %s736_s18 = sphi %s778_s18, %s964_s18  }
   0x3   : > { %p29_p1 = scmp.ge.s32.totalorder %s27_s21, 2  ;;  %p226_p2 = scmp.lt.s32.totalorder %s744_s20, 3 }
   0x5   : > { %s967_s21 = smov (%p29_p1, %s27_s21), 0  ;;  %p227_p3 = pnand %p585_p0, %p226_p2 }
   0x6   : > { %p264_p4 = scmp.lt.s32.totalorder (!%p227_p3), %s736_s18, 1 }
   0x7   : > { %230 = sbr.rel (%p227_p3) target bundleno = 438 (0x1b6), region = 40 }
   0xc   : > { %v301_v0 = vld [vmem:[%s959_s1 + $0x78] sm:$0xff]  ;;  %v746_v1 = vmov 0.0   ;;  %v300_v2 = vld [vmem:[%s959_s1 + $0x70] sm:$0xff]  ;;  %vm747_vm0 = vmmov 0   ;;  %v299_v3 = vld [vmem:[%s959_s1 + $0x68] sm:$0xff]  ;;  %s969_s18 = smov (!%p264_p4, %s736_s18), 1 }
   0xd   : > { %626 = vmatprep.subr.mxu0 %v746_v1  ;;  %658 = vmatprep.mubr.msk.f32.mxu0 %vm747_vm0, %v746_v1  ;;  %v298_v4 = vld [vmem:[%s959_s1 + $0x60] sm:$0xff]  ;;  %v395_v5 = vld [vmem:[%s961_s3 + $0x78] sm:$0xff]  ;;  %v394_v6 = vld [vmem:[%s961_s3 + $0x70] sm:$0xff]  ;;  %s586_s28 = sshll.u32 %s969_s18, 3 }
   0xe   : > { %627 = vmatpush3.msra.mxu0 %v301_v0  ;;  %661 = vmatprep.subr.mxu1 %v746_v1  ;;  %v297_v7 = vld [vmem:[%s959_s1 + $0x58] sm:$0xff]  ;;  %v393_v8 = vld [vmem:[%s961_s3 + $0x68] sm:$0xff]  ;;  %v296_v9 = vld [vmem:[%s959_s1 + $0x50] sm:$0xff]  ;;  %s267_s12 = scalar_lea.vmem %s958_s0, %s586_s28  ;;  %s284_s9 = scalar_lea.vmem %s963_s5, %s586_s28 }
   0xf   : > { %628 = vmatprep.subr.mxu0 %v746_v1  ;;  %693 = vmatprep.mubr.msk.f32.mxu1 %vm747_vm0, %v746_v1  ;;  %v392_v10 = vld [vmem:[%s961_s3 + $0x60] sm:$0xff]  ;;  %v295_v11 = vld [vmem:[%s959_s1 + $0x48] sm:$0xff]  ;;  %v391_v12 = vld [vmem:[%s961_s3 + $0x58] sm:$0xff] }
  0x10   : > { %629 = vmatpush3.msra.mxu0 %v300_v2  ;;  %662 = vmatpush3.msra.mxu1 %v395_v5  ;;  %v294_v13 = vld [vmem:[%s959_s1 + $0x40] sm:$0xff]  ;;  %v390_v14 = vld [vmem:[%s961_s3 + $0x50] sm:$0xff]  ;;  %v293_v15 = vld [vmem:[%s959_s1 + $0x38] sm:$0xff] }
  0x11   : > { %630 = vmatprep.subr.mxu0 %v746_v1  ;;  %663 = vmatprep.subr.mxu1 %v746_v1  ;;  %v389_v16 = vld [vmem:[%s961_s3 + $0x48] sm:$0xff]  ;;  %v292_v17 = vld [vmem:[%s959_s1 + $0x30] sm:$0xff]  ;;  %v388_v18 = vld [vmem:[%s961_s3 + $0x40] sm:$0xff] }
  0x12   : > { %631 = vmatpush3.msra.mxu0 %v299_v3  ;;  %664 = vmatpush3.msra.mxu1 %v394_v6  ;;  %v291_v19 = vld [vmem:[%s959_s1 + $0x28] sm:$0xff]  ;;  %v387_v20 = vld [vmem:[%s961_s3 + $0x38] sm:$0xff]  ;;  %v290_v21 = vld [vmem:[%s959_s1 + $0x20] sm:$0xff] }
  0x13   : > { %632 = vmatprep.subr.mxu0 %v746_v1  ;;  %665 = vmatprep.subr.mxu1 %v746_v1  ;;  %v386_v22 = vld [vmem:[%s961_s3 + $0x30] sm:$0xff]  ;;  %v289_v23 = vld [vmem:[%s959_s1 + $0x18] sm:$0xff]  ;;  %v385_v24 = vld [vmem:[%s961_s3 + $0x28] sm:$0xff] }
  0x14   : > { %633 = vmatpush3.msra.mxu0 %v298_v4  ;;  %666 = vmatpush3.msra.mxu1 %v393_v8  ;;  %v288_v25 = vld [vmem:[%s959_s1 + $0x10] sm:$0xff]  ;;  %v384_v26 = vld [vmem:[%s961_s3 + $0x20] sm:$0xff]  ;;  %v287_v27 = vld [vmem:[%s959_s1 + $0x8] sm:$0xff] }
  0x15   : > { %634 = vmatprep.subr.mxu0 %v746_v1  ;;  %667 = vmatprep.subr.mxu1 %v746_v1  ;;  %v383_v28 = vld [vmem:[%s961_s3 + $0x18] sm:$0xff]  ;;  %v286_v29 = vld [vmem:[%s959_s1] sm:$0xff]  ;;  %v382_v31 = vld [vmem:[%s961_s3 + $0x10] sm:$0xff] }
  0x16   : > { %635 = vmatpush3.msra.mxu0 %v297_v7  ;;  %668 = vmatpush3.msra.mxu1 %v392_v10  ;;  %v285_v30 = vld [vmem:[%s267_s12] sm:$0xff]  ;;  %v381_v32 = vld [vmem:[%s961_s3 + $0x8] sm:$0xff] }
  0x17   : > { %636 = vmatprep.subr.mxu0 %v746_v1  ;;  %669 = vmatprep.subr.mxu1 %v746_v1  ;;  %v380_v33 = vld [vmem:[%s961_s3] sm:$0xff] }
  0x18   : > { %637 = vmatpush3.msra.mxu0 %v296_v9  ;;  %670 = vmatpush3.msra.mxu1 %v391_v12  ;;  %v588_v34 = vld [vmem:[%s960_s2] ss:$0 sm:$0xff] }
  0x19   : > { %638 = vmatprep.subr.mxu0 %v746_v1  ;;  %671 = vmatprep.subr.mxu1 %v746_v1  ;;  %v589_v39 = vld [vmem:[%s962_s4] ss:$0 sm:$0xff] }
  0x1a   : > { %639 = vmatpush3.msra.mxu0 %v295_v11  ;;  %672 = vmatpush3.msra.mxu1 %v390_v14 }
  0x1b   : > { %640 = vmatprep.subr.mxu0 %v746_v1  ;;  %673 = vmatprep.subr.mxu1 %v746_v1 }
  0x1c   : > { %641 = vmatpush3.msra.mxu0 %v294_v13  ;;  %674 = vmatpush3.msra.mxu1 %v389_v16 }
  0x1d   : > { %642 = vmatprep.subr.mxu0 %v746_v1  ;;  %675 = vmatprep.subr.mxu1 %v746_v1 }
  0x1e   : > { %643 = vmatpush3.msra.mxu0 %v293_v15  ;;  %676 = vmatpush3.msra.mxu1 %v388_v18 }
  0x1f   : > { %644 = vmatprep.subr.mxu0 %v746_v1  ;;  %677 = vmatprep.subr.mxu1 %v746_v1 }
  0x20   : > { %645 = vmatpush3.msra.mxu0 %v292_v17  ;;  %678 = vmatpush3.msra.mxu1 %v387_v20 }
  0x21   : > { %646 = vmatprep.subr.mxu0 %v746_v1  ;;  %679 = vmatprep.subr.mxu1 %v746_v1 }
  0x22   : > { %647 = vmatpush3.msra.mxu0 %v291_v19  ;;  %680 = vmatpush3.msra.mxu1 %v386_v22 }
  0x23   : > { %648 = vmatprep.subr.mxu0 %v746_v1  ;;  %681 = vmatprep.subr.mxu1 %v746_v1 }
  0x24   : > { %649 = vmatpush3.msra.mxu0 %v290_v21  ;;  %682 = vmatpush3.msra.mxu1 %v385_v24 }
  0x25   : > { %650 = vmatprep.subr.mxu0 %v746_v1  ;;  %683 = vmatprep.subr.mxu1 %v746_v1 }
  0x26   : > { %651 = vmatpush3.msra.mxu0 %v289_v23  ;;  %684 = vmatpush3.msra.mxu1 %v384_v26 }
  0x27   : > { %652 = vmatprep.subr.mxu0 %v746_v1  ;;  %685 = vmatprep.subr.mxu1 %v746_v1 }
  0x28   : > { %653 = vmatpush3.msra.mxu0 %v288_v25  ;;  %686 = vmatpush3.msra.mxu1 %v383_v28 }
  0x29   : > { %654 = vmatprep.subr.mxu0 %v746_v1  ;;  %687 = vmatprep.subr.mxu1 %v746_v1 }
  0x2a   : > { %655 = vmatpush3.msra.mxu0 %v287_v27  ;;  %688 = vmatpush3.msra.mxu1 %v382_v31 }
  0x2b   : > { %656 = vmatprep.subr.mxu0 %v746_v1  ;;  %689 = vmatprep.subr.mxu1 %v746_v1 }
  0x2c   : > { %657 = vmatpush3.msra.mxu0 %v286_v29  ;;  %690 = vmatpush3.msra.mxu1 %v381_v32 }
  0x2d   : > { %659 = vmatmul.mubr.f32.vlgmr.msra.gmra.mxu0 %v285_v30  ;;  %691 = vmatprep.subr.mxu1 %v746_v1 }
  0x2e   : > { %692 = vmatpush3.msra.mxu1 %v380_v33 }
  0xed   : > { %v375_v35 = vpop.f32.mrf.mxu0 }
  0xee   : > { %v376_v36 = vadd.f32 %v588_v34, %v375_v35 }
  0xef   : > { %v660_v37 = vpop.f32.mrf.mxu0 }
  0xf0   : > { %v379_v38 = vmax.f32 %v376_v36, 0.0 }
  0xf2   : > { %694 = vmatmul.mubr.f32.vlgmr.msra.gmra.mxu1 %v379_v38 }
 0x1b2   : > { %v469_v40 = vpop.f32.mrf.mxu1 }
 0x1b3   : > { %v470_v41 = vadd.f32 %v589_v39, %v469_v40 }
 0x1b4   : > { %v695_v42 = vpop.f32.mrf.mxu1 }
 0x1b5   : > { %473 = vst [vmem:[%s284_s9] sm:$0xff] %v470_v41 }
 0x1b6 PF: > { %s15_s20 = sadd.s32 1, %s744_s20   ;;  %s964_s18 = smov %s740_s19 }
 0x1b7   : > { %p12_p5 = scmp.ge.s32.totalorder %s15_s20, 4   ;;  %s965_s19 = smov %s967_s21 }
 0x1b9   :  { %14 = sbr.rel (!%p12_p5) target bundleno = 2 (0x2), region = 79 }

</bundles_post_ra>
